<compile_context>
chip_gen: v6e
topology: v6e:2x2x1
jax: 0.10.0
libtpu: 0.0.40
codegen_flags: <defaults>
</compile_context>

<pallas_src>
import jax
import jax.numpy as jnp
from jax.experimental import pallas as pl
from jax.experimental.pallas import tpu as pltpu

BINSP = 64      # 49 RoIAlign bins padded to 64 (multiple of bf16 sublane tile)
RB = 8          # ROIs per grid step in the ROI kernel
_VMEM_LIMIT = 32 * 1024 * 1024


def _pick_tile(total, target, mult):
    """Largest tile <= target that divides `total` and is a multiple of `mult`;
    falls back to the full extent (always legal as a block dim)."""
    if total <= target:
        return total
    t = (target // mult) * mult
    while t >= mult:
        if total % t == 0:
            return t
        t -= mult
    return total


# ---------------------------------------------------------------------------
# Kernel 1: attention gate  -- 1x1 conv (C -> 1) + sigmoid, output [N, HW, 1]
# (the x * attention product is folded into the ROI kernel; the big gated
#  feature map is never materialized)
# ---------------------------------------------------------------------------
def _gate_kernel(feat_ref, w_ref, b_ref, gate_ref):
    f = feat_ref[0]                                                    # [T, C] bf16
    a = jnp.dot(f, w_ref[...], preferred_element_type=jnp.float32)    # [T, 1]
    gate_ref[0] = jax.nn.sigmoid(a + b_ref[...])


def attention_gate_pallas(feat_bf16, att_w_bf16, att_b_f32):
    N, HW, C = feat_bf16.shape
    T = _pick_tile(HW, 512, 16)
    return pl.pallas_call(
        _gate_kernel,
        out_shape=jax.ShapeDtypeStruct((N, HW, 1), jnp.float32),
        grid_spec=pltpu.PrefetchScalarGridSpec(
            num_scalar_prefetch=0,
            grid=(N, HW // T),
            in_specs=[
                pl.BlockSpec((1, T, C), lambda n, t: (n, t, 0)),
                pl.BlockSpec((C, 1), lambda n, t: (0, 0)),
                pl.BlockSpec((1, 1), lambda n, t: (0, 0)),
            ],
            out_specs=pl.BlockSpec((1, T, 1), lambda n, t: (n, t, 0)),
        ),
        compiler_params=pltpu.CompilerParams(
            dimension_semantics=("parallel", "parallel"),
            vmem_limit_bytes=_VMEM_LIMIT),
    )(feat_bf16, att_w_bf16, att_b_f32)


# ---------------------------------------------------------------------------
# Kernel 2: RoIAlign hot path (gate folded in, RB ROIs per step).
#   roi[block] = (wmat[block] ⊙ gate[img]) reshaped to (RB*64, HW)  @  feat[img]
# Per-block image index comes in via scalar prefetch and drives the feat/gate
# index_maps; consecutive blocks with the same image skip the feat re-DMA.
# ---------------------------------------------------------------------------
def _roi_kernel(bidx_ref, wmat_ref, gate_ref, feat_ref, out_ref):
    rb, binsp, hw = wmat_ref.shape
    wg = wmat_ref[...] * gate_ref[0]                                   # [rb, 64, hw] bf16
    res = jnp.dot(wg.reshape(rb * binsp, hw), feat_ref[0],
                  preferred_element_type=jnp.float32)                  # [rb*64, C]
    out_ref[...] = res.reshape(out_ref.shape).astype(out_ref.dtype)


def roi_align_pallas(wmat_bf16, gate_t_bf16, feat_bf16, bidx_blk):
    R_pad, binsp, HW = wmat_bf16.shape
    N, _, C = feat_bf16.shape
    return pl.pallas_call(
        _roi_kernel,
        out_shape=jax.ShapeDtypeStruct((R_pad, binsp, C), jnp.bfloat16),
        grid_spec=pltpu.PrefetchScalarGridSpec(
            num_scalar_prefetch=1,
            grid=(R_pad // RB,),
            in_specs=[
                pl.BlockSpec((RB, binsp, HW), lambda r, bidx: (r, 0, 0)),
                pl.BlockSpec((1, 1, HW), lambda r, bidx: (bidx[r], 0, 0)),
                pl.BlockSpec((1, HW, C), lambda r, bidx: (bidx[r], 0, 0)),
            ],
            out_specs=pl.BlockSpec((RB, binsp, C), lambda r, bidx: (r, 0, 0)),
        ),
        compiler_params=pltpu.CompilerParams(
            dimension_semantics=("parallel",),
            vmem_limit_bytes=_VMEM_LIMIT),
    )(bidx_blk, wmat_bf16, gate_t_bf16, feat_bf16)


# ---------------------------------------------------------------------------
# Kernel 3: classifier MLP  -- Linear -> ReLU -> (Dropout: eval identity) -> Linear
# K-tiled reduction over the flattened ROI feature dimension, f32 accumulator,
# second layer fused into the last K step.
# ---------------------------------------------------------------------------
def _mlp_kernel(x_ref, w1_ref, b1_ref, w2_ref, b2_ref, out_ref, acc_ref):
    k = pl.program_id(0)

    @pl.when(k == 0)
    def _():
        acc_ref[...] = jnp.zeros_like(acc_ref)

    acc_ref[...] += jnp.dot(x_ref[...], w1_ref[...],
                            preferred_element_type=jnp.float32)

    @pl.when(k == pl.num_programs(0) - 1)
    def _():
        h = jnp.maximum(acc_ref[...] + b1_ref[...], 0.0)
        # Dropout(0.5) is identity at inference time.
        out_ref[...] = (jnp.dot(h.astype(w2_ref.dtype), w2_ref[...],
                                preferred_element_type=jnp.float32)
                        + b2_ref[...])


def classifier_pallas(x_bf16, w1_bf16, b1_f32, w2_bf16, b2_f32):
    R_pad, K = x_bf16.shape
    _, HID = w1_bf16.shape
    TK = _pick_tile(K, 2048, 128)
    return pl.pallas_call(
        _mlp_kernel,
        out_shape=jax.ShapeDtypeStruct((R_pad, 1), jnp.float32),
        grid_spec=pltpu.PrefetchScalarGridSpec(
            num_scalar_prefetch=0,
            grid=(K // TK,),
            in_specs=[
                pl.BlockSpec((R_pad, TK), lambda k: (0, k)),
                pl.BlockSpec((TK, HID), lambda k: (k, 0)),
                pl.BlockSpec((1, HID), lambda k: (0, 0)),
                pl.BlockSpec((HID, 1), lambda k: (0, 0)),
                pl.BlockSpec((1, 1), lambda k: (0, 0)),
            ],
            out_specs=pl.BlockSpec((R_pad, 1), lambda k: (0, 0)),
            scratch_shapes=[pltpu.VMEM((R_pad, HID), jnp.float32)],
        ),
        compiler_params=pltpu.CompilerParams(
            dimension_semantics=("arbitrary",),
            vmem_limit_bytes=_VMEM_LIMIT),
    )(x_bf16, w1_bf16, b1_f32, w2_bf16, b2_f32)


# ---------------------------------------------------------------------------
# Plain-JAX glue: torchvision RoIAlign (aligned=False, sampling_ratio=2,
# spatial_scale=1 since image_shapes == featmap shape) expressed as a per-ROI
# bilinear weight matrix [R, 49, H*W].
# ---------------------------------------------------------------------------
def roi_align_weight_matrix(boxes, H, W, out_size=7, sampling_ratio=2, spatial_scale=1.0):
    boxes = boxes.astype(jnp.float32) * spatial_scale
    x1, y1, x2, y2 = boxes[:, 0], boxes[:, 1], boxes[:, 2], boxes[:, 3]
    roi_w = jnp.maximum(x2 - x1, 1.0)          # aligned=False clamps to >= 1
    roi_h = jnp.maximum(y2 - y1, 1.0)
    bin_h = roi_h / out_size
    bin_w = roi_w / out_size

    def axis_weights(start, bin_sz, size):
        p = jnp.arange(out_size, dtype=jnp.float32)
        s = jnp.arange(sampling_ratio, dtype=jnp.float32)
        coord = (start[:, None, None]
                 + p[None, :, None] * bin_sz[:, None, None]
                 + (s[None, None, :] + 0.5) * bin_sz[:, None, None] / sampling_ratio)
        valid = jnp.logical_and(coord >= -1.0, coord <= size).astype(jnp.float32)
        c = jnp.maximum(coord, 0.0)
        lo = jnp.floor(c).astype(jnp.int32)
        at_edge = lo >= size - 1
        lo = jnp.where(at_edge, size - 1, lo)
        hi = jnp.where(at_edge, size - 1, lo + 1)
        c = jnp.where(at_edge, lo.astype(jnp.float32), c)
        frac = c - lo.astype(jnp.float32)
        one_lo = jax.nn.one_hot(lo, size, dtype=jnp.float32)
        one_hi = jax.nn.one_hot(hi, size, dtype=jnp.float32)
        w = ((1.0 - frac)[..., None] * one_lo + frac[..., None] * one_hi) * valid[..., None]
        return w.sum(axis=2)                   # sum over the 2 samples -> [R, 7, size]

    Sy = axis_weights(y1, bin_h, H)            # [R, 7, H]
    Sx = axis_weights(x1, bin_w, W)            # [R, 7, W]
    Wm = jnp.einsum('rph,rqw->rpqhw', Sy, Sx)  # separable bilinear weights
    R = boxes.shape[0]
    return Wm.reshape(R, out_size * out_size, H * W) / float(sampling_ratio ** 2)


# ---------------------------------------------------------------------------
# Full forward (post-backbone): gate -> gated RoIAlign -> classifier
# ---------------------------------------------------------------------------
def key_head_detector_forward(params, features_nchw, boxes):
    N, C, H, W = features_nchw.shape
    HW = H * W
    R = boxes.shape[0]
    R_pad = ((R + RB - 1) // RB) * RB

    # channels-last, bf16 feature map (C on the 128-lane axis)
    feat = jnp.transpose(features_nchw, (0, 2, 3, 1)).reshape(N, HW, C)
    feat = feat.astype(jnp.bfloat16)

    # attention gate [N, HW, 1] -> lane-major [N, 1, HW] for folding into wmat
    gate = attention_gate_pallas(feat, params['att_w'].astype(jnp.bfloat16),
                                 params['att_b'])
    gate_t = jnp.transpose(gate, (0, 2, 1)).astype(jnp.bfloat16)       # [N, 1, HW]

    # RoIAlign weights: pad bins 49->64 and R -> multiple of RB, bf16
    wmat = roi_align_weight_matrix(boxes, H, W)                        # [R, 49, HW]
    wmat = jnp.pad(wmat, ((0, R_pad - R), (0, BINSP - 49), (0, 0)))
    wmat = wmat.astype(jnp.bfloat16)

    # boxes_list = [boxes] in the torch module => every ROI belongs to image 0.
    # (ROI blocks must be grouped by image; trivially true for a single image.)
    bidx_blk = jnp.zeros((R_pad // RB,), jnp.int32)

    roi = roi_align_pallas(wmat, gate_t, feat, bidx_blk)               # [R_pad, 64, C] bf16
    roi_flat = roi.reshape(R_pad, BINSP * C)                           # bin-major flatten

    # Fold the torch [R, C, 7, 7].view(R, -1) channel-major flatten into a
    # static permutation + zero-padding of w1 (rows reordered to bin-major,
    # padded bins get zero weights).
    K1, HID = params['w1'].shape                                       # K1 = C*49
    w1p = params['w1'].reshape(C, 49, HID).transpose(1, 0, 2)          # [49, C, HID]
    w1p = jnp.pad(w1p, ((0, BINSP - 49), (0, 0), (0, 0))).reshape(BINSP * C, HID)

    logits = classifier_pallas(roi_flat, w1p.astype(jnp.bfloat16), params['b1'],
                               params['w2'].astype(jnp.bfloat16), params['b2'])
    return logits[:R]                                                  # drop ROI padding


if __name__ == "__main__":
    # small stand-in sizes: 2048 -> C=32 channels, feature map 8x8, hidden 1024 -> 64
    N, C, H, W = 2, 32, 8, 8
    HIDDEN = 64

    key = jax.random.PRNGKey(0)
    k1, k2, k3, k4 = jax.random.split(key, 4)

    params = {
        'att_w': jax.random.normal(k1, (C, 1), jnp.float32) * 0.1,      # Conv2d(C,1,1) weight
        'att_b': jnp.zeros((1, 1), jnp.float32),                        # Conv2d bias
        'w1': jax.random.normal(k2, (C * 7 * 7, HIDDEN), jnp.float32) * 0.02,
        'b1': jnp.zeros((1, HIDDEN), jnp.float32),
        'w2': jax.random.normal(k3, (HIDDEN, 1), jnp.float32) * 0.02,
        'b2': jnp.zeros((1, 1), jnp.float32),
    }

    # backbone feature map stand-in (NCHW) and ROI boxes (x1, y1, x2, y2)
    features = jax.random.normal(k4, (N, C, H, W), jnp.float32)
    boxes = jnp.array([[0.5, 0.5, 6.0, 6.5],
                       [1.0, 2.0, 7.5, 7.0],
                       [0.0, 0.0, 8.0, 8.0]], jnp.float32)

    out = key_head_detector_forward(params, features, boxes)
    jax.block_until_ready(out)
    assert out.shape == (boxes.shape[0], 1)
    print("KERNEL_OK")
</pallas_src>

<mosaic_0001>
module attributes {stable_mosaic.version = 11 : i64} {
  func.func @_gate_kernel(%arg0: i32, %arg1: i32, %arg2: memref<1x64x32xbf16, #tpu.memory_space<vmem>>, %arg3: memref<32x1xbf16, #tpu.memory_space<vmem>>, %arg4: memref<1x1xf32, #tpu.memory_space<vmem>>, %arg5: memref<1x64x1xf32, #tpu.memory_space<vmem>>) attributes {dimension_semantics = [#tpu.dimension_semantics<parallel>, #tpu.dimension_semantics<parallel>], iteration_bounds = array<i64: 2, 1>, scalar_prefetch = 0 : i64, scratch_operands = 0 : i64, tpu.core_type = #tpu.core_type<tc>, window_params = [{transform_indices = @transform_0, window_bounds = array<i64: 1, 64, 32>}, {pipeline_mode = #tpu.pipeline_mode<synchronous>, transform_indices = @transform_1, window_bounds = array<i64: 32, 1>}, {pipeline_mode = #tpu.pipeline_mode<synchronous>, transform_indices = @transform_2, window_bounds = array<i64: 1, 1>}, {transform_indices = @transform_3, window_bounds = array<i64: 1, 64, 1>}]} {
    %c0 = arith.constant 0 : index
    %c0_0 = arith.constant 0 : index
    %c0_1 = arith.constant 0 : index
    %0 = vector.load %arg2[%c0, %c0_0, %c0_1] : memref<1x64x32xbf16, #tpu.memory_space<vmem>>, vector<1x64x32xbf16>
    %1 = vector.shape_cast %0 : vector<1x64x32xbf16> to vector<64x32xbf16>
    %c0_2 = arith.constant 0 : index
    %c0_3 = arith.constant 0 : index
    %2 = vector.load %arg3[%c0_2, %c0_3] : memref<32x1xbf16, #tpu.memory_space<vmem>>, vector<32x1xbf16>
    %cst = arith.constant dense<0.000000e+00> : vector<64x1xf32>
    %3 = tpu.matmul %1, %2, %cst {dimension_numbers = #tpu.dot_dimension_numbers<[1], [0], [0], [1], [0, 0, 1, 1], [], []>} : vector<64x32xbf16>, vector<32x1xbf16>, vector<64x1xf32> -> vector<64x1xf32>
    %c0_4 = arith.constant 0 : index
    %c0_5 = arith.constant 0 : index
    %4 = vector.load %arg4[%c0_4, %c0_5] : memref<1x1xf32, #tpu.memory_space<vmem>>, vector<1x1xf32>
    %5 = vector.broadcast %4 : vector<1x1xf32> to vector<64x1xf32>
    %6 = arith.addf %3, %5 : vector<64x1xf32>
    %7 = arith.negf %6 : vector<64x1xf32>
    %8 = math.exp %7 : vector<64x1xf32>
    %cst_6 = arith.constant 1.000000e+00 : f32
    %9 = vector.broadcast %cst_6 : f32 to vector<64x1xf32>
    %10 = arith.addf %9, %8 : vector<64x1xf32>
    %11 = arith.divf %9, %10 : vector<64x1xf32>
    %c0_7 = arith.constant 0 : index
    %c0_8 = arith.constant 0 : index
    %c0_9 = arith.constant 0 : index
    %12 = vector.load %arg5[%c0_7, %c0_8, %c0_9] : memref<1x64x1xf32, #tpu.memory_space<vmem>>, vector<1x64x1xf32>
    %13 = vector.shape_cast %12 : vector<1x64x1xf32> to vector<64x1xf32>
    %14 = vector.shape_cast %11 : vector<64x1xf32> to vector<1x64x1xf32>
    tpu.vector_store %arg5[%c0_7, %c0_8, %c0_9], %14 {strides = array<i32>} : memref<1x64x1xf32, #tpu.memory_space<vmem>>, vector<1x64x1xf32>,
    return
  }
  func.func @transform_0(%arg0: i32, %arg1: i32) -> (i32, i32, i32) {
    %c0_i32 = arith.constant 0 : i32
    %c0_i32_0 = arith.constant 0 : i32
    return %arg0, %arg1, %c0_i32 : i32, i32, i32
  }
  func.func @transform_1(%arg0: i32, %arg1: i32) -> (i32, i32) {
    %c0_i32 = arith.constant 0 : i32
    %c0_i32_0 = arith.constant 0 : i32
    %c0_i32_1 = arith.constant 0 : i32
    return %c0_i32, %c0_i32_0 : i32, i32
  }
  func.func @transform_2(%arg0: i32, %arg1: i32) -> (i32, i32) {
    %c0_i32 = arith.constant 0 : i32
    %c0_i32_0 = arith.constant 0 : i32
    %c0_i32_1 = arith.constant 0 : i32
    return %c0_i32, %c0_i32_0 : i32, i32
  }
  func.func @transform_3(%arg0: i32, %arg1: i32) -> (i32, i32, i32) {
    %c0_i32 = arith.constant 0 : i32
    %c0_i32_0 = arith.constant 0 : i32
    return %arg0, %arg1, %c0_i32 : i32, i32, i32
  }
}

</mosaic_0001>

<bundles_post_ra>
// kernel: tpu_custom_call.1
= control target key start
LH: loop header
LB: loop body
LE: loop exit
PB: predicated region body
PF: predicated region fallthrough
CT: control target
= control target key end

     0   :  { %s649_s14 = smov 0   ;;  %s651_s15 = smov 0   ;;  %s700_s0 = inlined_call_operand.vmem [shape: bf16[2,64,32], index: 0, kind: input, shape index: {}]   ;;  %s701_s1 = inlined_call_operand.vmem [shape: bf16[32,1], index: 1, kind: input, shape index: {}]   ;;  %s702_s2 = inlined_call_operand.<no memory space> [shape: f32[1,1], index: 2, kind: input, shape index: {}]   ;;  %s703_s3 = inlined_call_operand.vmem [shape: f32[2,64,1], index: 3, kind: output, shape index: {}]  }
   0x1   :  { %v8_v0 = vstv %s702_s2  ;;  %s653_s16 = smov 0  }
   0x2   :  { %9 = vst [vmem:[#allocation2] sm:$0x1] %v8_v0 }
   0x3 LB: > { %s27_s2 = sadd.s32 1, %s620_s15  ;;  %p490_p0 = scmp.ge.s32.totalorder %s624_s16, 1  ;;  %s624_s16 = sphi %s653_s16, %s15_s16   ;;  %s620_s15 = sphi %s651_s15, %s705_s15   ;;  %s616_s14 = sphi %s649_s14, %s704_s14  }
   0x4   : > { %p29_p1 = scmp.ge.s32.totalorder %s27_s2, 2  ;;  %p160_p2 = scmp.lt.s32.totalorder %s624_s16, 3 }
   0x6   : > { %s707_s2 = smov (%p29_p1, %s27_s2), 0  ;;  %p161_p3 = pnand %p490_p0, %p160_p2 }
   0x7   : > { %p193_p4 = scmp.lt.s32.totalorder (!%p161_p3), %s616_s14, 1 }
   0x8   : > { %164 = sbr.rel (%p161_p3) target bundleno = 257 (0x101), region = 32 }
   0xd   : > { %v564_v1 = vld [vmem:[%s701_s1 + $0x8] sm:$0xff]   ;;  %v565_v2 = vld [vmem:[%s701_s1] sm:$0xff]   ;;  %s709_s14 = smov (!%p193_p4, %s616_s14), 1  ;;  %vm264_vm0 = vcmask 261120   ;;  %vm390_vm1 = vcmask 7168  }
   0xe   : > { %524 = vmatprep.subr.bf16.mxu0 %v564_v1  ;;  %536 = vmatprep.subr.bf16.mxu1 %v564_v1  ;;  %s516_s21 = sshll.u32 %s709_s14, 5  ;;  %v495_v7 = vld [vmem:[#allocation2] ss:$0 sm:$0xff]  ;;  %s517_s25 = sshll.u32 %s709_s14, 6 }
   0xf   : > { %525 = vmatpush3.bf16.msra.mxu0 %v564_v1  ;;  %538 = vmatpush3.bf16.msra.mxu1 %v564_v1  ;;  %s200_s24 = scalar_lea.vmem %s700_s0, %s516_s21  ;;  %s210_s28 = scalar_lea.vmem %s703_s3, %s517_s25 }
  0x10   : > { %526 = vmatprep.subr.bf16.mxu0 %v565_v2  ;;  %537 = vmatprep.subr.bf16.mxu1 %v565_v2  ;;  %v566_v3 = vld [vmem:[%s200_s24] sm:$0xff]   ;;  %v567_v4 = vld [vmem:[%s200_s24 + $0x10] sm:$0xff]   ;;  %v568_v5 = vld [vmem:[%s200_s24 + $0x8] sm:$0xff]  }
  0x11   : > { %528 = vmatprep.mubr.msk.bf16.mxu0 %vm264_vm0, %v566_v3  ;;  %532 = vmatprep.mubr.msk.bf16.mxu1 %vm264_vm0, %v567_v4  ;;  %v569_v6 = vld [vmem:[%s200_s24 + $0x18] sm:$0xff]  }
  0x13   : > { %527 = vmatpush3.bf16.msra.mxu0 %v565_v2  ;;  %539 = vmatpush3.bf16.msra.mxu1 %v565_v2 }
  0x16   : > { %529 = vmatmul.mubr.msk.bf16.vlgmr.msra.gmra.mxu0 %vm264_vm0, %v568_v5  ;;  %533 = vmatmul.mubr.msk.bf16.vlgmr.msra.gmra.mxu1 %vm264_vm0, %v569_v6 }
  0xd6   : > { %v530_v8 = vpop.f32.mrf.mxu0  ;;  %v534_v10 = vpop.f32.mrf.mxu1 }
  0xd7   : > { %v320_v9 = vadd.f32 %v530_v8, %v495_v7  ;;  %v336_v11 = vadd.f32 %v534_v10, %v495_v7 }
  0xd8   : > { %v311_v12 = vpop.f32.mrf.mxu0  ;;  %v327_v15 = vpop.f32.mrf.mxu1 }
  0xd9   : > { %v508_v13 = vmul.f32 -1.442695, %v320_v9  ;;  %v312_v14 = vadd.f32 %v495_v7, %v311_v12  ;;  %v512_v16 = vmul.f32 -1.442695, %v336_v11  ;;  %v328_v17 = vadd.f32 %v495_v7, %v327_v15 }
  0xda   : > { %v531_v18 = vpop.f32.mrf.mxu0  ;;  %v535_v21 = vpop.f32.mrf.mxu1 }
  0xdb   : > { %570 = vpow2.f32 %v508_v13  ;;  %v506_v19 = vmul.f32 -1.442695, %v312_v14  ;;  %v323_v20 = vadd.f32 %v531_v18, %v495_v7  ;;  %v510_v22 = vmul.f32 -1.442695, %v328_v17 }
  0xdc   : > { %572 = vpow2.f32 %v512_v16  ;;  %v339_v23 = vadd.f32 %v535_v21, %v495_v7  ;;  %v314_v24 = vpop.f32.mrf.mxu0  ;;  %v330_v27 = vpop.f32.mrf.mxu1 }
  0xdd   : > { %574 = vpow2.f32 %v506_v19  ;;  %v509_v25 = vmul.f32 -1.442695, %v323_v20  ;;  %v315_v26 = vadd.f32 %v495_v7, %v314_v24  ;;  %v331_v29 = vadd.f32 %v495_v7, %v330_v27 }
  0xde   : > { %576 = vpow2.f32 %v510_v22  ;;  %v513_v28 = vmul.f32 -1.442695, %v339_v23 }
  0xdf   : > { %578 = vpow2.f32 %v509_v25  ;;  %v507_v30 = vmul.f32 -1.442695, %v315_v26  ;;  %v511_v31 = vmul.f32 -1.442695, %v331_v29 }
  0xe0   : > { %580 = vpow2.f32 %v513_v28 }
  0xe1   : > { %582 = vpow2.f32 %v507_v30 }
  0xe2   : > { %584 = vpow2.f32 %v511_v31 }
  0xe8   : > { %v571_v32 = vpop.eup %570 }
  0xe9   : > { %v573_v33 = vpop.eup %572  ;;  %v368_v34 = vadd.f32 1.0, %v571_v32 }
  0xea   : > { %v575_v35 = vpop.eup %574  ;;  %v372_v36 = vadd.f32 1.0, %v573_v33 }
  0xeb   : > { %v577_v37 = vpop.eup %576  ;;  %586 = vrcp.f32 %v368_v34  ;;  %v366_v38 = vadd.f32 1.0, %v575_v35 }
  0xec   : > { %v579_v39 = vpop.eup %578  ;;  %588 = vrcp.f32 %v372_v36  ;;  %v370_v40 = vadd.f32 1.0, %v577_v37 }
  0xed   : > { %v581_v41 = vpop.eup %580  ;;  %590 = vrcp.f32 %v366_v38  ;;  %v369_v42 = vadd.f32 1.0, %v579_v39 }
  0xee   : > { %v583_v43 = vpop.eup %582  ;;  %592 = vrcp.f32 %v370_v40  ;;  %v373_v44 = vadd.f32 1.0, %v581_v41 }
  0xef   : > { %v585_v45 = vpop.eup %584  ;;  %594 = vrcp.f32 %v369_v42  ;;  %v367_v46 = vadd.f32 1.0, %v583_v43 }
  0xf0   : > { %596 = vrcp.f32 %v373_v44  ;;  %v371_v47 = vadd.f32 1.0, %v585_v45 }
  0xf1   : > { %598 = vrcp.f32 %v367_v46 }
  0xf2   : > { %600 = vrcp.f32 %v371_v47 }
  0xf8   : > { %v587_v48 = vpop.eup %586 }
  0xf9   : > { %v589_v49 = vpop.eup %588  ;;  %393 = vst.msk [vmem:[%s210_s28 + $0x10] sm:$0xff] %vm390_vm1, %v587_v48 }
  0xfa   : > { %v591_v50 = vpop.eup %590  ;;  %397 = vst.msk [vmem:[%s210_s28 + $0x30] sm:$0xff] %vm390_vm1, %v589_v49 }
  0xfb   : > { %v593_v51 = vpop.eup %592  ;;  %391 = vst.msk [vmem:[%s210_s28] sm:$0xff] %vm390_vm1, %v591_v50 }
  0xfc   : > { %v595_v52 = vpop.eup %594  ;;  %395 = vst.msk [vmem:[%s210_s28 + $0x20] sm:$0xff] %vm390_vm1, %v593_v51 }
  0xfd   : > { %v597_v53 = vpop.eup %596  ;;  %394 = vst.msk [vmem:[%s210_s28 + $0x18] sm:$0xff] %vm390_vm1, %v595_v52 }
  0xfe   : > { %v599_v54 = vpop.eup %598  ;;  %398 = vst.msk [vmem:[%s210_s28 + $0x38] sm:$0xff] %vm390_vm1, %v597_v53 }
  0xff   : > { %v601_v55 = vpop.eup %600  ;;  %392 = vst.msk [vmem:[%s210_s28 + $0x8] sm:$0xff] %vm390_vm1, %v599_v54 }
 0x100   : > { %396 = vst.msk [vmem:[%s210_s28 + $0x28] sm:$0xff] %vm390_vm1, %v601_v55 }
 0x101 PF: > { %s15_s16 = sadd.s32 1, %s624_s16   ;;  %s704_s14 = smov %s620_s15 }
 0x102   : > { %p12_p5 = scmp.ge.s32.totalorder %s15_s16, 4   ;;  %s705_s15 = smov %s707_s2 }
 0x104   :  { %14 = sbr.rel (!%p12_p5) target bundleno = 3 (0x3), region = 62 }

</bundles_post_ra>
